<compile_context>
chip_gen: v6e
topology: v6e:2x2x1
jax: 0.10.0
libtpu: 0.0.40
codegen_flags: <defaults>
</compile_context>

<pallas_src>
import jax
import jax.numpy as jnp
from jax.experimental import pallas as pl
from jax.experimental.pallas import tpu as pltpu

_LANE = 128


def _round_up(n, m):
    return ((n + m - 1) // m) * m


def mlp_kernel(x_ref, w1_ref, b1_ref, w2_ref, b2_ref, w3_ref, b3_ref, o_ref):
    # x_ref: (tm, D_pad) f32 tile; cast to bf16 in-register for the MXU, accumulate f32.
    x = x_ref[...].astype(jnp.bfloat16)

    # fc1 + relu   (dropout fc1_drop is identity in eval mode)
    h1 = jnp.dot(x, w1_ref[...], preferred_element_type=jnp.float32) + b1_ref[...]
    h1 = jnp.maximum(h1, 0.0)

    # fc2 + relu   (dropout fc2_drop is identity in eval mode)
    h2 = jnp.dot(h1.astype(w2_ref.dtype), w2_ref[...],
                 preferred_element_type=jnp.float32) + b2_ref[...]
    h2 = jnp.maximum(h2, 0.0)

    # output layer; padded class columns carry bias -1e30 so they vanish from the
    # log_softmax normalizer (mask folded into b3 in the wrapper).
    logits = jnp.dot(h2.astype(w3_ref.dtype), w3_ref[...],
                     preferred_element_type=jnp.float32) + b3_ref[...]

    # Numerically stable log_softmax over the class axis.
    m = jnp.max(logits, axis=-1, keepdims=True)
    shifted = logits - m
    lse = jnp.log(jnp.sum(jnp.exp(shifted), axis=-1, keepdims=True))
    o_ref[...] = (shifted - lse).astype(o_ref.dtype)


def _pick_tile(B):
    """Batch tile: multiple of 16 rows; >= 2 grid steps for larger batches (megacore)."""
    if B <= 32:
        return _round_up(B, 16)
    return max(16, min(1024, _round_up((B + 1) // 2, 16)))


def neural_net_forward(x_nchw, params):
    """x_nchw: (B, C, H, W) float32. Returns (B, num_classes) log-probabilities."""
    w1, b1, w2, b2, w3, b3 = params
    B = x_nchw.shape[0]
    D = w1.shape[0]
    Hh = w1.shape[1]
    C = w3.shape[1]

    D_pad = _round_up(D, _LANE)
    H_pad = _round_up(Hh, _LANE)
    C_pad = _round_up(C, _LANE)

    # Flatten NCHW row-major -> matches PyTorch x.view(-1, W*W*C). No pad / no cast:
    # x goes to the kernel as f32 (D is already lane-aligned for this config).
    x_flat = x_nchw.reshape(B, D).astype(jnp.float32)
    if D % _LANE:  # generic fallback; not hit for image_width=16, color_channels=4
        x_flat = jnp.pad(x_flat, ((0, 0), (0, D_pad - D)))

    def pad_w(w, rows, cols):
        return jnp.zeros((rows, cols), jnp.bfloat16).at[:w.shape[0], :w.shape[1]].set(
            w.astype(jnp.bfloat16))

    def pad_b(b, cols, pad_value=0.0):
        return jnp.full((1, cols), jnp.float32(pad_value)).at[:, :b.shape[1]].set(
            b.astype(jnp.float32))

    w1p, b1p = pad_w(w1, D_pad, H_pad), pad_b(b1, H_pad)
    w2p, b2p = pad_w(w2, H_pad, H_pad), pad_b(b2, H_pad)
    # Fold the padded-class mask into the output bias: padded columns get -1e30.
    w3p, b3p = pad_w(w3, H_pad, C_pad), pad_b(b3, C_pad, pad_value=-1e30)

    tm = _pick_tile(B)
    grid = (pl.cdiv(B, tm),)

    # Weights/biases stay VMEM-resident across batch tiles (constant block index).
    resident = lambda shape: pl.BlockSpec(shape, lambda i: (0, 0))

    out = pl.pallas_call(
        mlp_kernel,
        out_shape=jax.ShapeDtypeStruct((B, C_pad), jnp.float32),
        grid=grid,
        in_specs=[
            pl.BlockSpec((tm, D_pad), lambda i: (i, 0)),   # x tile (f32), pipelined
            resident((D_pad, H_pad)),                      # W1 (bf16)
            resident((1, H_pad)),                          # b1 (f32)
            resident((H_pad, H_pad)),                      # W2 (bf16)
            resident((1, H_pad)),                          # b2 (f32)
            resident((H_pad, C_pad)),                      # W3 (bf16)
            resident((1, C_pad)),                          # b3 (f32, -1e30 in pad cols)
        ],
        out_specs=pl.BlockSpec((tm, C_pad), lambda i: (i, 0)),
        compiler_params=pltpu.CompilerParams(
            dimension_semantics=("parallel",),             # batch tiles across TCs (v7x)
            vmem_limit_bytes=32 << 20,
        ),
    )(x_flat, w1p, b1p, w2p, b2p, w3p, b3p)

    return out[:, :C]


def neural_net_reference(x_nchw, params):
    """Pure-JAX f32 reference of the eval-mode PyTorch forward."""
    w1, b1, w2, b2, w3, b3 = params
    x = x_nchw.reshape(x_nchw.shape[0], -1)
    h1 = jax.nn.relu(x @ w1 + b1)
    h2 = jax.nn.relu(h1 @ w2 + b2)
    return jax.nn.log_softmax(h2 @ w3 + b3, axis=-1)


def init_params(key, in_dim, hidden, num_classes):
    """Deterministic init mimicking nn.Linear's U(-1/sqrt(fan_in), 1/sqrt(fan_in))."""
    ks = jax.random.split(key, 6)

    def linear(kw, kb, fan_in, fan_out):
        bound = 1.0 / jnp.sqrt(jnp.float32(fan_in))
        w = jax.random.uniform(kw, (fan_in, fan_out), jnp.float32, -bound, bound)
        b = jax.random.uniform(kb, (1, fan_out), jnp.float32, -bound, bound)
        return w, b

    w1, b1 = linear(ks[0], ks[1], in_dim, hidden)
    w2, b2 = linear(ks[2], ks[3], hidden, hidden)
    w3, b3 = linear(ks[4], ks[5], hidden, num_classes)
    return (w1, b1, w2, b2, w3, b3)


if __name__ == "__main__":
    # Module hyperparameters (small, consistent with the PyTorch module):
    #   image_width=16, color_channels=4, number_hidden_nodes=32,
    #   number_hidden_layers=2, activation='relu', number_of_classes=10
    B, Cc, H, W = 2, 4, 16, 16
    hidden = 32
    num_classes = 10
    in_dim = W * W * Cc

    key = jax.random.PRNGKey(0)
    kx, kp = jax.random.split(key)
    x = jax.random.normal(kx, (B, Cc, H, W), dtype=jnp.float32)
    params = init_params(kp, in_dim, hidden, num_classes)

    out = neural_net_forward(x, params)
    jax.block_until_ready(out)

    # Sanity checks: shape, log_softmax rows sum to ~1 in prob space, and agreement
    # with the f32 reference within bf16-matmul tolerance (not expected to bit-match).
    ref = neural_net_reference(x, params)
    probs_sum = jnp.sum(jnp.exp(out), axis=-1)
    assert out.shape == (B, num_classes)
    assert bool(jnp.all(jnp.abs(probs_sum - 1.0) < 1e-3))
    assert bool(jnp.max(jnp.abs(out - ref)) < 0.1)

    # TODO(synk): training-mode dropout (fc1_drop / fc2_drop) omitted; eval-mode forward only.
    print("KERNEL_OK")
</pallas_src>

<mosaic_0001>
module attributes {stable_mosaic.version = 11 : i64} {
  func.func @mlp_kernel(%arg0: i32, %arg1: memref<16x1024xf32, #tpu.memory_space<vmem>>, %arg2: memref<1024x128xbf16, #tpu.memory_space<vmem>>, %arg3: memref<1x128xf32, #tpu.memory_space<vmem>>, %arg4: memref<128x128xbf16, #tpu.memory_space<vmem>>, %arg5: memref<1x128xf32, #tpu.memory_space<vmem>>, %arg6: memref<128x128xbf16, #tpu.memory_space<vmem>>, %arg7: memref<1x128xf32, #tpu.memory_space<vmem>>, %arg8: memref<16x128xf32, #tpu.memory_space<vmem>>) attributes {dimension_semantics = [#tpu.dimension_semantics<parallel>], iteration_bounds = array<i64: 1>, scalar_prefetch = 0 : i64, scratch_operands = 0 : i64, tpu.core_type = #tpu.core_type<tc>, window_params = [{transform_indices = @transform_0, window_bounds = array<i64: 16, 1024>}, {pipeline_mode = #tpu.pipeline_mode<synchronous>, transform_indices = @transform_1, window_bounds = array<i64: 1024, 128>}, {pipeline_mode = #tpu.pipeline_mode<synchronous>, transform_indices = @transform_2, window_bounds = array<i64: 1, 128>}, {pipeline_mode = #tpu.pipeline_mode<synchronous>, transform_indices = @transform_3, window_bounds = array<i64: 128, 128>}, {pipeline_mode = #tpu.pipeline_mode<synchronous>, transform_indices = @transform_4, window_bounds = array<i64: 1, 128>}, {pipeline_mode = #tpu.pipeline_mode<synchronous>, transform_indices = @transform_5, window_bounds = array<i64: 128, 128>}, {pipeline_mode = #tpu.pipeline_mode<synchronous>, transform_indices = @transform_6, window_bounds = array<i64: 1, 128>}, {transform_indices = @transform_7, window_bounds = array<i64: 16, 128>}]} {
    %c0 = arith.constant 0 : index
    %c0_0 = arith.constant 0 : index
    %0 = vector.load %arg1[%c0, %c0_0] : memref<16x1024xf32, #tpu.memory_space<vmem>>, vector<16x1024xf32>
    %1 = arith.truncf %0 : vector<16x1024xf32> to vector<16x1024xbf16>
    %c0_1 = arith.constant 0 : index
    %c0_2 = arith.constant 0 : index
    %2 = vector.load %arg2[%c0_1, %c0_2] : memref<1024x128xbf16, #tpu.memory_space<vmem>>, vector<1024x128xbf16>
    %cst = arith.constant dense<0.000000e+00> : vector<16x128xf32>
    %3 = tpu.matmul %1, %2, %cst {dimension_numbers = #tpu.dot_dimension_numbers<[1], [0], [0], [1], [0, 0, 1, 1], [], []>} : vector<16x1024xbf16>, vector<1024x128xbf16>, vector<16x128xf32> -> vector<16x128xf32>
    %c0_3 = arith.constant 0 : index
    %c0_4 = arith.constant 0 : index
    %4 = vector.load %arg3[%c0_3, %c0_4] : memref<1x128xf32, #tpu.memory_space<vmem>>, vector<1x128xf32>
    %5 = vector.broadcast %4 : vector<1x128xf32> to vector<16x128xf32>
    %6 = arith.addf %3, %5 : vector<16x128xf32>
    %cst_5 = arith.constant 0.000000e+00 : f32
    %7 = vector.broadcast %cst_5 : f32 to vector<16x128xf32>
    %8 = arith.maximumf %6, %7 : vector<16x128xf32>
    %9 = arith.truncf %8 : vector<16x128xf32> to vector<16x128xbf16>
    %c0_6 = arith.constant 0 : index
    %c0_7 = arith.constant 0 : index
    %10 = vector.load %arg4[%c0_6, %c0_7] : memref<128x128xbf16, #tpu.memory_space<vmem>>, vector<128x128xbf16>
    %cst_8 = arith.constant dense<0.000000e+00> : vector<16x128xf32>
    %11 = tpu.matmul %9, %10, %cst_8 {dimension_numbers = #tpu.dot_dimension_numbers<[1], [0], [0], [1], [0, 0, 1, 1], [], []>} : vector<16x128xbf16>, vector<128x128xbf16>, vector<16x128xf32> -> vector<16x128xf32>
    %c0_9 = arith.constant 0 : index
    %c0_10 = arith.constant 0 : index
    %12 = vector.load %arg5[%c0_9, %c0_10] : memref<1x128xf32, #tpu.memory_space<vmem>>, vector<1x128xf32>
    %13 = vector.broadcast %12 : vector<1x128xf32> to vector<16x128xf32>
    %14 = arith.addf %11, %13 : vector<16x128xf32>
    %cst_11 = arith.constant 0.000000e+00 : f32
    %15 = vector.broadcast %cst_11 : f32 to vector<16x128xf32>
    %16 = arith.maximumf %14, %15 : vector<16x128xf32>
    %17 = arith.truncf %16 : vector<16x128xf32> to vector<16x128xbf16>
    %c0_12 = arith.constant 0 : index
    %c0_13 = arith.constant 0 : index
    %18 = vector.load %arg6[%c0_12, %c0_13] : memref<128x128xbf16, #tpu.memory_space<vmem>>, vector<128x128xbf16>
    %cst_14 = arith.constant dense<0.000000e+00> : vector<16x128xf32>
    %19 = tpu.matmul %17, %18, %cst_14 {dimension_numbers = #tpu.dot_dimension_numbers<[1], [0], [0], [1], [0, 0, 1, 1], [], []>} : vector<16x128xbf16>, vector<128x128xbf16>, vector<16x128xf32> -> vector<16x128xf32>
    %c0_15 = arith.constant 0 : index
    %c0_16 = arith.constant 0 : index
    %20 = vector.load %arg7[%c0_15, %c0_16] : memref<1x128xf32, #tpu.memory_space<vmem>>, vector<1x128xf32>
    %21 = vector.broadcast %20 : vector<1x128xf32> to vector<16x128xf32>
    %22 = arith.addf %19, %21 : vector<16x128xf32>
    %cst_17 = arith.constant dense<0xFF800000> : vector<16xf32>
    %23 = vector.multi_reduction <maximumf>, %22, %cst_17 [1] : vector<16x128xf32> to vector<16xf32>
    %24 = vector.shape_cast %23 : vector<16xf32> to vector<16x1xf32>
    %25 = vector.broadcast %24 : vector<16x1xf32> to vector<16x128xf32>
    %26 = arith.subf %22, %25 : vector<16x128xf32>
    %27 = math.exp %26 : vector<16x128xf32>
    %cst_18 = arith.constant dense<0.000000e+00> : vector<16xf32>
    %28 = vector.multi_reduction <add>, %27, %cst_18 [1] : vector<16x128xf32> to vector<16xf32>
    %29 = vector.shape_cast %28 : vector<16xf32> to vector<16x1xf32>
    %30 = math.log %29 : vector<16x1xf32>
    %31 = vector.broadcast %30 : vector<16x1xf32> to vector<16x128xf32>
    %32 = arith.subf %26, %31 : vector<16x128xf32>
    %c0_19 = arith.constant 0 : index
    %c0_20 = arith.constant 0 : index
    %33 = vector.load %arg8[%c0_19, %c0_20] : memref<16x128xf32, #tpu.memory_space<vmem>>, vector<16x128xf32>
    tpu.vector_store %arg8[%c0_19, %c0_20], %32 {strides = array<i32>} : memref<16x128xf32, #tpu.memory_space<vmem>>, vector<16x128xf32>,
    return
  }
  func.func @transform_0(%arg0: i32) -> (i32, i32) {
    %c0_i32 = arith.constant 0 : i32
    %c0_i32_0 = arith.constant 0 : i32
    return %arg0, %c0_i32 : i32, i32
  }
  func.func @transform_1(%arg0: i32) -> (i32, i32) {
    %c0_i32 = arith.constant 0 : i32
    %c0_i32_0 = arith.constant 0 : i32
    %c0_i32_1 = arith.constant 0 : i32
    return %c0_i32, %c0_i32_0 : i32, i32
  }
  func.func @transform_2(%arg0: i32) -> (i32, i32) {
    %c0_i32 = arith.constant 0 : i32
    %c0_i32_0 = arith.constant 0 : i32
    %c0_i32_1 = arith.constant 0 : i32
    return %c0_i32, %c0_i32_0 : i32, i32
  }
  func.func @transform_3(%arg0: i32) -> (i32, i32) {
    %c0_i32 = arith.constant 0 : i32
    %c0_i32_0 = arith.constant 0 : i32
    %c0_i32_1 = arith.constant 0 : i32
    return %c0_i32, %c0_i32_0 : i32, i32
  }
  func.func @transform_4(%arg0: i32) -> (i32, i32) {
    %c0_i32 = arith.constant 0 : i32
    %c0_i32_0 = arith.constant 0 : i32
    %c0_i32_1 = arith.constant 0 : i32
    return %c0_i32, %c0_i32_0 : i32, i32
  }
  func.func @transform_5(%arg0: i32) -> (i32, i32) {
    %c0_i32 = arith.constant 0 : i32
    %c0_i32_0 = arith.constant 0 : i32
    %c0_i32_1 = arith.constant 0 : i32
    return %c0_i32, %c0_i32_0 : i32, i32
  }
  func.func @transform_6(%arg0: i32) -> (i32, i32) {
    %c0_i32 = arith.constant 0 : i32
    %c0_i32_0 = arith.constant 0 : i32
    %c0_i32_1 = arith.constant 0 : i32
    return %c0_i32, %c0_i32_0 : i32, i32
  }
  func.func @transform_7(%arg0: i32) -> (i32, i32) {
    %c0_i32 = arith.constant 0 : i32
    %c0_i32_0 = arith.constant 0 : i32
    return %arg0, %c0_i32 : i32, i32
  }
}

</mosaic_0001>

<bundles_post_ra>
// kernel: tpu_custom_call.1
= control target key start
LH: loop header
LB: loop body
LE: loop exit
PB: predicated region body
PF: predicated region fallthrough
CT: control target
= control target key end

     0   :  { %12 = vsyncpa [#allocation3], 0  ;;  %s1823_s0 = inlined_call_operand.hbm [shape: f32[2,1024], index: 0, kind: input, shape index: {}]   ;;  %s1824_s1 = inlined_call_operand.hbm [shape: bf16[1024,128], index: 1, kind: input, shape index: {}]   ;;  %s1825_s2 = inlined_call_operand.vmem [shape: f32[1,128], index: 2, kind: input, shape index: {}]   ;;  %s1826_s3 = inlined_call_operand.hbm [shape: bf16[128,128], index: 3, kind: input, shape index: {}]   ;;  %s1827_s4 = inlined_call_operand.vmem [shape: f32[1,128], index: 4, kind: input, shape index: {}]   ;;  %s1828_s5 = inlined_call_operand.hbm [shape: bf16[128,128], index: 5, kind: input, shape index: {}]   ;;  %s1829_s6 = inlined_call_operand.vmem [shape: f32[1,128], index: 6, kind: input, shape index: {}]   ;;  %s1830_s7 = inlined_call_operand.hbm [shape: f32[2,128], index: 7, kind: output, shape index: {}]  }
   0x1   :  { %13 = vsyncpa [#allocation6], 0 }
   0x2   :  { %14 = vsyncpa [#allocation9], 0 }
   0x3   :  { %15 = vsyncpa [#allocation4], 0 }
   0x4   :  { %20 = vsyncadd [#allocation3], 1792  ;;  %s1700_s24 = smov [#allocation5]  }
   0x5   :  { %s33_s25 = sshll.u32 %s1700_s24, 4  ;;  %s34_s25 = int_to_ptr.vmem [resolvable:$true] %s33_s25 }
   0x6   :  { %s1600_s26 = scalar_lea.vmem %s34_s25, 8192  ;;  %p1605_p1 = scmp.lt.s32.totalorder %s34_s25, %s34_s25 }
   0x7   :  { %p1601_p0 = scmp.ne.s32.totalorder %s34_s25, %s1600_s26  ;;  %p1606_p2 = scmp.lt.s32.totalorder %s1600_s26, %s1600_s26 }
   0x9   :  { %p1607_p3 = por %p1606_p2, %p1605_p1 }
   0xb   :  { %p1608_p4 = pnand %p1607_p3, %p1601_p0 }
   0xd   :  { %1611 = shalt.err (!%p1608_p4)
}
   0xe   :  { %s1701_s27 = smov 64   ;;  %s1702_s28 = smov 4  }
   0xf   :  { %39 = dma.hbm_to_vmem [thread:$0]  %s1824_s1, 8192, %s34_s25, [#allocation6], %s1701_s27, %s1701_s27, %s1702_s28  }
  0x10   :  { %s1703_s8 = smov [#allocation2]  }
  0x11   :  { %s21_s9 = sshll.u32 %s1703_s8, 4  ;;  %s22_s9 = int_to_ptr.vmem [resolvable:$true] %s21_s9 }
  0x12   :  { %s1620_s10 = scalar_lea.vmem %s22_s9, 256  ;;  %s1624_s11 = scalar_lea.vmem %s22_s9, 2048 }
  0x13   :  { %p1621_p5 = scmp.ne.s32.totalorder %s22_s9, %s1620_s10  ;;  %p1625_p6 = scmp.lt.s32.totalorder %s22_s9, %s22_s9 }
  0x14   :  { %p1626_p7 = scmp.lt.s32.totalorder %s1624_s11, %s1620_s10 }
  0x16   :  { %p1627_p8 = por %p1626_p7, %p1625_p6 }
  0x18   :  { %p1628_p9 = pnand %p1627_p8, %p1621_p5 }
  0x1a   :  { %1631 = shalt.err (!%p1628_p9)
}
  0x1b   :  { %s1704_s12 = smov 256   ;;  %s1705_s13 = smov 16  }
  0x1c   :  { %27 = dma.hbm_to_vmem [thread:$0]  %s1823_s0, 256, %s22_s9, [#allocation3], %s1704_s12, %s1704_s12, %s1705_s13  }
  0x1d   :  { %s1706_s16 = smov [#allocation7]   ;;  %s1707_s1 = smov [#allocation8]  }
  0x1e   :  { %s47_s17 = sshll.u32 %s1706_s16, 4  ;;  %s61_s18 = sshll.u32 %s1707_s1, 4  ;;  %s48_s17 = int_to_ptr.vmem [resolvable:$true] %s47_s17  ;;  %s62_s18 = int_to_ptr.vmem [resolvable:$true] %s61_s18 }
  0x1f   :  { %s1640_s19 = scalar_lea.vmem %s48_s17, 1024  ;;  %p1645_p11 = scmp.lt.s32.totalorder %s48_s17, %s48_s17 }
  0x20   :  { %p1641_p10 = scmp.ne.s32.totalorder %s48_s17, %s1640_s19  ;;  %p1646_p12 = scmp.lt.s32.totalorder %s1640_s19, %s1640_s19 }
  0x22   :  { %p1647_p13 = por %p1646_p12, %p1645_p11 }
  0x24   :  { %p1648_p0 = pnand %p1647_p13, %p1641_p10 }
  0x26   :  { %1651 = shalt.err (!%p1648_p0)
}
  0x27   :  { %53 = dma.hbm_to_vmem [thread:$0]  %s1826_s3, 1024, %s48_s17, [#allocation6], %s1701_s27, %s1701_s27, %s1702_s28  }
  0x28   :  { %s1660_s0 = scalar_lea.vmem %s62_s18, 1024  ;;  %p1665_p2 = scmp.lt.s32.totalorder %s62_s18, %s62_s18 }
  0x29   :  { %p1661_p1 = scmp.ne.s32.totalorder %s62_s18, %s1660_s0  ;;  %p1666_p3 = scmp.lt.s32.totalorder %s1660_s0, %s1660_s0 }
  0x2b   :  { %p1667_p4 = por %p1666_p3, %p1665_p2 }
  0x2d   :  { %p1668_p5 = pnand %p1667_p4, %p1661_p1 }
  0x2f   :  { %1671 = shalt.err (!%p1668_p5)
}
  0x30   :  { %67 = dma.hbm_to_vmem [thread:$0]  %s1828_s5, 1024, %s62_s18, [#allocation9], %s1701_s27, %s1701_s27, %s1702_s28  }
  0x31   :  { %1692 = dma.done.wait [#allocation3], 2048  }
  0x32   :  { %1693 = vsyncadd [#allocation3], 4294965248 }
  0x33   :  { %1694 = dma.done.wait [#allocation6], 9216  }
  0x34   :  { %1695 = vsyncadd [#allocation6], 4294958080 }
  0x35   :  { %1696 = dma.done.wait [#allocation9], 1024  }
  0x36   :  { %1697 = vsyncadd [#allocation9], 4294966272  ;;  %v1480_v0 = vld [vmem:[#allocation5 + $0x78] sm:$0xff]   ;;  %v1484_v4 = vld [vmem:[#allocation5 + $0x70] sm:$0xff]   ;;  %v1708_v25 = vmov 1983009808   ;;  %v122_v27 = vlaneseq }
  0x37   :  { %v1481_v1 = vld [vmem:[#allocation5 + $0xf8] sm:$0xff]   ;;  %1320 = vmatprep.subr.bf16.mxu0 %v1480_v0  ;;  %v1485_v5 = vld [vmem:[#allocation5 + $0xf0] sm:$0xff]   ;;  %v1488_v8 = vld [vmem:[#allocation5 + $0x68] sm:$0xff]   ;;  %v120_v26 = vunpack.c.l.s4 %v1708_v25  ;;  %vm1710_vm0 = vmmov 0  }
  0x38   :  { %v1482_v2 = vld [vmem:[#allocation5 + $0x38] sm:$0xff]   ;;  %1342 = vmatprep.subr.bf16.mxu1 %v1481_v1  ;;  %v1486_v6 = vld [vmem:[#allocation5 + $0x30] sm:$0xff]   ;;  %v1489_v9 = vld [vmem:[#allocation5 + $0xe8] sm:$0xff]   ;;  %v123_v33 = vshrl.u32 %v122_v27, 7 }
  0x39   :  { %v1483_v3 = vld [vmem:[#allocation5 + $0xb8] sm:$0xff]   ;;  %1321 = vmatpush3.bf16.msra.mxu0 %v1482_v2  ;;  %v1487_v7 = vld [vmem:[#allocation5 + $0xb0] sm:$0xff]   ;;  %v1490_v10 = vld [vmem:[#allocation5 + $0x28] sm:$0xff]   ;;  %v121_v32 = vunpack.c.0.s8 %v120_v26 }
  0x3a   :  { %1343 = vmatpush3.bf16.msra.mxu1 %v1483_v3  ;;  %1322 = vmatprep.subr.bf16.mxu0 %v1484_v4  ;;  %v1491_v11 = vld [vmem:[#allocation5 + $0xa8] sm:$0xff]   ;;  %v1492_v12 = vld [vmem:[#allocation5 + $0x60] sm:$0xff]   ;;  %v1496_v16 = vld [vmem:[#allocation5 + $0x58] sm:$0xff]  }
  0x3b   :  { %1344 = vmatprep.subr.bf16.mxu1 %v1485_v5  ;;  %v1493_v13 = vld [vmem:[#allocation5 + $0xe0] sm:$0xff]   ;;  %v1497_v17 = vld [vmem:[#allocation5 + $0xd8] sm:$0xff]   ;;  %v1500_v20 = vld [vmem:[#allocation5 + $0x50] sm:$0xff]   ;;  %v1775_v37 = vsub.s32 %v121_v32, %v123_v33 }
  0x3c   :  { %v1494_v14 = vld [vmem:[#allocation5 + $0x20] sm:$0xff]   ;;  %v1498_v18 = vld [vmem:[#allocation5 + $0x18] sm:$0xff]   ;;  %v1501_v21 = vld [vmem:[#allocation5 + $0xd0] sm:$0xff]  }
  0x3d   :  { %1323 = vmatpush3.bf16.msra.mxu0 %v1486_v6  ;;  %v1495_v15 = vld [vmem:[#allocation5 + $0xa0] sm:$0xff]   ;;  %v1499_v19 = vld [vmem:[#allocation5 + $0x98] sm:$0xff]   ;;  %v1502_v22 = vld [vmem:[#allocation5 + $0x10] sm:$0xff]  }
  0x3e   :  { %1345 = vmatpush3.bf16.msra.mxu1 %v1487_v7  ;;  %1324 = vmatprep.subr.bf16.mxu0 %v1488_v8  ;;  %v1503_v23 = vld [vmem:[#allocation5 + $0x90] sm:$0xff]   ;;  %v1504_v24 = vld [vmem:[#allocation5 + $0x48] sm:$0xff]   ;;  %v1508_v31 = vld [vmem:[#allocation5 + $0x40] sm:$0xff]  }
  0x3f   :  { %1346 = vmatprep.subr.bf16.mxu1 %v1489_v9  ;;  %v1505_v28 = vld [vmem:[#allocation5 + $0xc8] sm:$0xff]   ;;  %v1509_v34 = vld [vmem:[#allocation5 + $0xc0] sm:$0xff]   ;;  %v1524_v53 = vld [vmem:[#allocation5 + $0x178] sm:$0xff]  }
  0x40   :  { %v1506_v29 = vld [vmem:[#allocation5 + $0x8] sm:$0xff]   ;;  %v1510_v35 = vld [vmem:[#allocation5] sm:$0xff]   ;;  %v1525_v58 = vld [vmem:[#allocation5 + $0x1f8] sm:$0xff]  }
  0x41   :  { %1325 = vmatpush3.bf16.msra.mxu0 %v1490_v10  ;;  %v1507_v30 = vld [vmem:[#allocation5 + $0x88] sm:$0xff]   ;;  %v1511_v36 = vld [vmem:[#allocation5 + $0x80] sm:$0xff]   ;;  %v1526_v62 = vld [vmem:[#allocation5 + $0x138] sm:$0xff]  }
  0x42   :  { %1347 = vmatpush3.bf16.msra.mxu1 %v1491_v11  ;;  %1326 = vmatprep.subr.bf16.mxu0 %v1492_v12  ;;  %v1512_v38 = vld [vmem:[#allocation2] ss:$16 sps:$4 sm:$0xff]   ;;  %v1520_v43 = vld [vmem:[#allocation2 + $0x4] ss:$16 sps:$4 sm:$0xff]   ;;  %v1527_v2 = vld [vmem:[#allocation5 + $0x1b8] sm:$0xff]  }
  0x43   :  { %1348 = vmatprep.subr.bf16.mxu1 %v1493_v13  ;;  %v1514_v39 = vld [vmem:[#allocation2 + $0x20] ss:$16 sps:$4 sm:$0xff]   ;;  %v125_v42 = vrot.slane %v1512_v38, %v1775_v37  ;;  %v1521_v44 = vld [vmem:[#allocation2 + $0x24] ss:$16 sps:$4 sm:$0xff]   ;;  %v132_v50 = vrot.slane %v1520_v43, %v1775_v37  ;;  %v1532_v10 = vld [vmem:[#allocation5 + $0x168] sm:$0xff]  }
  0x44   :  { %v1516_v40 = vld [vmem:[#allocation2 + $0x40] ss:$16 sps:$4 sm:$0xff]   ;;  %v1522_v45 = vld [vmem:[#allocation2 + $0x44] ss:$16 sps:$4 sm:$0xff]   ;;  %v139_v46 = vrot.slane %v1514_v39, %v1775_v37  ;;  %v146_v51 = vrot.slane %v1521_v44, %v1775_v37  ;;  %v1533_v11 = vld [vmem:[#allocation5 + $0x1e8] sm:$0xff]  }
  0x45   :  { %1327 = vmatpush3.bf16.msra.mxu0 %v1494_v14  ;;  %v1518_v41 = vld [vmem:[#allocation2 + $0x60] ss:$16 sps:$4 sm:$0xff]   ;;  %v197_v47 = vrot.slane %v1516_v40, %v1775_v37  ;;  %v1523_v49 = vld [vmem:[#allocation2 + $0x64] ss:$16 sps:$4 sm:$0xff]   ;;  %v204_v52 = vrot.slane %v1522_v45, %v1775_v37  ;;  %v1534_v12 = vld [vmem:[#allocation5 + $0x128] sm:$0xff]  }
  0x46   :  { %1349 = vmatpush3.bf16.msra.mxu1 %v1495_v15  ;;  %1328 = vmatprep.subr.bf16.mxu0 %v1496_v16  ;;  %v211_v48 = vrot.slane %v1518_v41, %v1775_v37  ;;  %v148_v54 = vcombine.high %v125_v42, %v139_v46  ;;  %v218_v56 = vrot.slane %v1523_v49, %v1775_v37  ;;  %v1528_v4 = vld [vmem:[#allocation5 + $0x170] sm:$0xff]   ;;  %v1535_v13 = vld [vmem:[#allocation5 + $0x1a8] sm:$0xff]   ;;  %v1536_v14 = vld [vmem:[#allocation5 + $0x160] sm:$0xff]  }
  0x47   :  { %1350 = vmatprep.subr.bf16.mxu1 %v1497_v17  ;;  %v147_v57 = vcombine.low %v125_v42, %v139_v46  ;;  %v150_v59 = vcombine.high %v132_v50, %v146_v51  ;;  %v149_v61 = vcombine.low %v132_v50, %v146_v51  ;;  %v1529_v7 = vld [vmem:[#allocation5 + $0x1f0] sm:$0xff]   ;;  %v1537_v15 = vld [vmem:[#allocation5 + $0x1e0] sm:$0xff]   ;;  %v1548_v26 = vld [vmem:[#allocation5 + $0x148] sm:$0xff]  }
  0x48   :  { %v220_v55 = vcombine.high %v197_v47, %v211_v48  ;;  %v219_v60 = vcombine.low %v197_v47, %v211_v48  ;;  %v222_v0 = vcombine.high %v204_v52, %v218_v56  ;;  %v221_v1 = vcombine.low %v204_v52, %v218_v56  ;;  %v1530_v8 = vld [vmem:[#allocation5 + $0x130] sm:$0xff]   ;;  %v1538_v16 = vld [vmem:[#allocation5 + $0x120] sm:$0xff]   ;;  %v1549_v27 = vld [vmem:[#allocation5 + $0x1c8] sm:$0xff]  }
  0x49   :  { %1329 = vmatpush3.bf16.msra.mxu0 %v1498_v18  ;;  %v1531_v9 = vld [vmem:[#allocation5 + $0x1b0] sm:$0xff]   ;;  %v1539_v17 = vld [vmem:[#allocation5 + $0x1a0] sm:$0xff]   ;;  %v1540_v18 = vld [vmem:[#allocation5 + $0x158] sm:$0xff]  }
  0x4a   :  { %1351 = vmatpush3.bf16.msra.mxu1 %v1499_v19  ;;  %1330 = vmatprep.subr.bf16.mxu0 %v1500_v20  ;;  %v276_v63 = vpack.c.bf16 %v220_v55, %v148_v54  ;;  %v275_v3 = vpack.c.bf16 %v219_v60, %v147_v57  ;;  %v278_v5 = vpack.c.bf16 %v222_v0, %v150_v59  ;;  %v1541_v19 = vld [vmem:[#allocation5 + $0x1d8] sm:$0xff]   ;;  %v1547_v25 = vld [vmem:[#allocation5 + $0x190] sm:$0xff]   ;;  %v1554_v32 = vld [vmem:[#allocation5 + $0x100] sm:$0xff]   ;;  %v1709_v0 = vmov 0.0  }
  0x4b   :  { %1352 = vmatprep.subr.bf16.mxu1 %v1501_v21  ;;  %v277_v6 = vpack.c.bf16 %v221_v1, %v149_v61  ;;  %v1542_v20 = vld [vmem:[#allocation5 + $0x118] sm:$0xff]   ;;  %v1555_v33 = vld [vmem:[#allocation5 + $0x180] sm:$0xff]   ;;  %v1570_v1 = vld [vmem:[#allocation7 + $0x28] sm:$0xff]  }
  0x4c   :  { %834 = vmatprep.mubr.bf16.mxu0 %v276_v63  ;;  %875 = vmatprep.mubr.bf16.mxu1 %v278_v5  ;;  %v1543_v21 = vld [vmem:[#allocation5 + $0x198] sm:$0xff]   ;;  %v1574_v5 = vld [vmem:[#allocation7 + $0x8] sm:$0xff]  }
  0x4d   :  { %1331 = vmatpush3.bf16.msra.mxu0 %v1502_v22  ;;  %v1544_v22 = vld [vmem:[#allocation5 + $0x150] sm:$0xff]   ;;  %v1562_v38 = vld [vmem:[#allocation2 + $0x68] ss:$16 sps:$4 sm:$0xff]   ;;  %v1564_v39 = vld [vmem:[#allocation2 + $0xc] ss:$16 sps:$4 sm:$0xff]  }
  0x4e   :  { %1353 = vmatpush3.bf16.msra.mxu1 %v1503_v23  ;;  %1332 = vmatprep.subr.bf16.mxu0 %v1504_v24  ;;  %v1545_v23 = vld [vmem:[#allocation5 + $0x1d0] sm:$0xff]   ;;  %v1565_v40 = vld [vmem:[#allocation2 + $0x2c] ss:$16 sps:$4 sm:$0xff]   ;;  %v247_v46 = vrot.slane %v1562_v38, %v1775_v37  ;;  %v168_v47 = vrot.slane %v1564_v39, %v1775_v37 }
  0x4f   :  { %1354 = vmatprep.subr.bf16.mxu1 %v1505_v28  ;;  %v1546_v24 = vld [vmem:[#allocation5 + $0x110] sm:$0xff]   ;;  %v1550_v28 = vld [vmem:[#allocation5 + $0x108] sm:$0xff]   ;;  %v182_v48 = vrot.slane %v1565_v40, %v1775_v37  ;;  %v1568_v63 = vld [vmem:[#allocation7 + $0x38] sm:$0xff]  }
  0x50   :  { %v1566_v44 = vld [vmem:[#allocation2 + $0x4c] ss:$16 sps:$4 sm:$0xff]  }
  0x51   :  { %1333 = vmatpush3.bf16.msra.mxu0 %v1506_v29  ;;  %v1551_v29 = vld [vmem:[#allocation5 + $0x188] sm:$0xff]   ;;  %v240_v50 = vrot.slane %v1566_v44, %v1775_v37  ;;  %v186_v54 = vcombine.high %v168_v47, %v182_v48  ;;  %v185_v56 = vcombine.low %v168_v47, %v182_v48 }
  0x52   :  { %1355 = vmatpush3.bf16.msra.mxu1 %v1507_v30  ;;  %1334 = vmatprep.subr.bf16.mxu0 %v1508_v31  ;;  %v1552_v30 = vld [vmem:[#allocation5 + $0x140] sm:$0xff]   ;;  %v1567_v45 = vld [vmem:[#allocation2 + $0x6c] ss:$16 sps:$4 sm:$0xff]  }
  0x53   :  { %1356 = vmatprep.subr.bf16.mxu1 %v1509_v34  ;;  %v1553_v31 = vld [vmem:[#allocation5 + $0x1c0] sm:$0xff]   ;;  %v1556_v34 = vld [vmem:[#allocation2 + $0x8] ss:$16 sps:$4 sm:$0xff]   ;;  %v254_v51 = vrot.slane %v1567_v45, %v1775_v37 }
  0x54   :  { %v161_v41 = vrot.slane %v1556_v34, %v1775_v37 }
  0x55   :  { %1335 = vmatpush3.bf16.msra.mxu0 %v1510_v35  ;;  %v1558_v35 = vld [vmem:[#allocation2 + $0x28] ss:$16 sps:$4 sm:$0xff]   ;;  %v258_v57 = vcombine.high %v240_v50, %v254_v51 }
  0x56   :  { %1357 = vmatpush3.bf16.msra.mxu1 %v1511_v36  ;;  %1364 = vmatprep.subr.bf16.mxu0 %v1524_v53  ;;  %v1560_v36 = vld [vmem:[#allocation2 + $0x48] ss:$16 sps:$4 sm:$0xff]   ;;  %v175_v42 = vrot.slane %v1558_v35, %v1775_v37 }
  0x57   :  { %1386 = vmatprep.subr.bf16.mxu1 %v1525_v58  ;;  %v233_v43 = vrot.slane %v1560_v36, %v1775_v37  ;;  %v257_v58 = vcombine.low %v240_v50, %v254_v51  ;;  %v282_v61 = vpack.c.bf16 %v258_v57, %v186_v54  ;;  %v1569_v37 = vld [vmem:[#allocation7 + $0x30] sm:$0xff]   ;;  %v1582_v50 = vld [vmem:[#allocation8 + $0x8] sm:$0xff]   ;;  %v1583_v51 = vld [vmem:[#allocation8] sm:$0xff]  }
  0x58   :  { %835 = vmatmul.mubr.bf16.vlgmr.msra.gmra.mxu0 %v275_v3  ;;  %v184_v49 = vcombine.high %v161_v41, %v175_v42  ;;  %v183_v52 = vcombine.low %v161_v41, %v175_v42  ;;  %v1572_v3 = vld [vmem:[#allocation7 + $0x18] sm:$0xff]  }
  0x59   :  { %1365 = vmatpush3.bf16.msra.mxu0 %v1526_v62  ;;  %876 = vmatmul.mubr.bf16.vlgmr.msra.gmra.mxu1 %v277_v6  ;;  %v256_v53 = vcombine.high %v233_v43, %v247_v46  ;;  %v255_v55 = vcombine.low %v233_v43, %v247_v46  ;;  %v281_v62 = vpack.c.bf16 %v257_v58, %v185_v56  ;;  %v1575_v6 = vld [vmem:[#allocation7] sm:$0xff]  }
  0x5a   :  { %1366 = vmatprep.subr.bf16.mxu0 %v1528_v4  ;;  %1387 = vmatpush3.bf16.msra.mxu1 %v1527_v2  ;;  %v1571_v2 = vld [vmem:[#allocation7 + $0x20] sm:$0xff]   ;;  %v1573_v4 = vld [vmem:[#allocation7 + $0x10] sm:$0xff]  }
  0x5b   :  { %1388 = vmatprep.subr.bf16.mxu1 %v1529_v7  ;;  %v280_v59 = vpack.c.bf16 %v256_v53, %v184_v49  ;;  %v279_v60 = vpack.c.bf16 %v255_v55, %v183_v52  ;;  %957 = vmatprep.mubr.bf16.mxu1 %v282_v61  ;;  %v1576_v7 = vld [vmem:[#allocation8 + $0x38] sm:$0xff]   ;;  %v1581_v49 = vld [vmem:[#allocation8 + $0x10] sm:$0xff]   ;;  %v1302_v52 = vld [vmem:[%s1827_s4] ss:$0 sm:$0xff] }
  0x5d   :  { %1367 = vmatpush3.bf16.msra.mxu0 %v1530_v8  ;;  %916 = vmatprep.mubr.bf16.mxu0 %v280_v59  ;;  %v1577_v8 = vld [vmem:[#allocation8 + $0x30] sm:$0xff]  }
  0x5e   :  { %1368 = vmatprep.subr.bf16.mxu0 %v1532_v10  ;;  %1389 = vmatpush3.bf16.msra.mxu1 %v1531_v9  ;;  %v1578_v9 = vld [vmem:[#allocation8 + $0x28] sm:$0xff]   ;;  %v1579_v10 = vld [vmem:[#allocation8 + $0x20] sm:$0xff]  }
  0x5f   :  { %1390 = vmatprep.subr.bf16.mxu1 %v1533_v11  ;;  %v1580_v11 = vld [vmem:[#allocation8 + $0x18] sm:$0xff]  }
  0x61   :  { %1369 = vmatpush3.bf16.msra.mxu0 %v1534_v12 }
  0x62   :  { %1370 = vmatprep.subr.bf16.mxu0 %v1536_v14  ;;  %1391 = vmatpush3.bf16.msra.mxu1 %v1535_v13 }
  0x63   :  { %1392 = vmatprep.subr.bf16.mxu1 %v1537_v15 }
  0x65   :  { %1371 = vmatpush3.bf16.msra.mxu0 %v1538_v16 }
  0x66   :  { %1372 = vmatprep.subr.bf16.mxu0 %v1540_v18  ;;  %1393 = vmatpush3.bf16.msra.mxu1 %v1539_v17 }
  0x67   :  { %1394 = vmatprep.subr.bf16.mxu1 %v1541_v19  ;;  %v1237_v19 = vld [vmem:[%s1825_s2] ss:$0 sm:$0xff] }
  0x69   :  { %1373 = vmatpush3.bf16.msra.mxu0 %v1542_v20 }
  0x6a   :  { %1374 = vmatprep.subr.bf16.mxu0 %v1544_v22  ;;  %1395 = vmatpush3.bf16.msra.mxu1 %v1543_v21 }
  0x6b   :  { %1396 = vmatprep.subr.bf16.mxu1 %v1545_v23 }
  0x6d   :  { %1375 = vmatpush3.bf16.msra.mxu0 %v1546_v24 }
  0x6e   :  { %1376 = vmatprep.subr.bf16.mxu0 %v1548_v26  ;;  %1397 = vmatpush3.bf16.msra.mxu1 %v1547_v25 }
  0x6f   :  { %1398 = vmatprep.subr.bf16.mxu1 %v1549_v27 }
  0x71   :  { %1377 = vmatpush3.bf16.msra.mxu0 %v1550_v28 }
  0x72   :  { %1378 = vmatprep.subr.bf16.mxu0 %v1552_v30  ;;  %1399 = vmatpush3.bf16.msra.mxu1 %v1551_v29 }
  0x73   :  { %1400 = vmatprep.subr.bf16.mxu1 %v1553_v31 }
  0x75   :  { %1379 = vmatpush3.bf16.msra.mxu0 %v1554_v32 }
  0x76   :  { %1401 = vmatpush3.bf16.msra.mxu1 %v1555_v33  ;;  %1426 = vmatprep.subr.bf16.mxu0 %v1709_v0 }
  0x77   :  { %1446 = vmatprep.subr.bf16.mxu1 %v1709_v0 }
  0x78   :  { %917 = vmatmul.mubr.bf16.vlgmr.msra.gmra.mxu0 %v279_v60 }
  0x79   :  { %958 = vmatmul.mubr.bf16.vlgmr.msra.gmra.mxu1 %v281_v62  ;;  %1427 = vmatpush3.bf16.msra.mxu0 %v1568_v63  ;;  %v1311_v62 = vld [vmem:[%s1829_s6] ss:$0 sm:$0xff] }
  0x7a   :  { %1428 = vmatprep.subr.bf16.mxu0 %v1709_v0  ;;  %1442 = vmatprep.mubr.msk.bf16.mxu0 %vm1710_vm0, %v1709_v0 }
  0x7b   :  { %1462 = vmatprep.mubr.msk.bf16.mxu1 %vm1710_vm0, %v1709_v0  ;;  %1447 = vmatpush3.bf16.msra.mxu1 %v1576_v7 }
  0x7c   :  { %1448 = vmatprep.subr.bf16.mxu1 %v1709_v0 }
  0x7d   :  { %1429 = vmatpush3.bf16.msra.mxu0 %v1569_v37 }
  0x7e   :  { %1430 = vmatprep.subr.bf16.mxu0 %v1709_v0 }
  0x7f   :  { %1449 = vmatpush3.bf16.msra.mxu1 %v1577_v8 }
  0x80   :  { %1450 = vmatprep.subr.bf16.mxu1 %v1709_v0 }
  0x81   :  { %1431 = vmatpush3.bf16.msra.mxu0 %v1570_v1 }
  0x82   :  { %1432 = vmatprep.subr.bf16.mxu0 %v1709_v0 }
  0x83   :  { %1451 = vmatpush3.bf16.msra.mxu1 %v1578_v9 }
  0x84   :  { %1452 = vmatprep.subr.bf16.mxu1 %v1709_v0 }
  0x85   :  { %1433 = vmatpush3.bf16.msra.mxu0 %v1571_v2 }
  0x86   :  { %1434 = vmatprep.subr.bf16.mxu0 %v1709_v0 }
  0x87   :  { %1453 = vmatpush3.bf16.msra.mxu1 %v1579_v10 }
  0x88   :  { %1454 = vmatprep.subr.bf16.mxu1 %v1709_v0 }
  0x89   :  { %1435 = vmatpush3.bf16.msra.mxu0 %v1572_v3 }
  0x8a   :  { %1436 = vmatprep.subr.bf16.mxu0 %v1709_v0 }
  0x8b   :  { %1455 = vmatpush3.bf16.msra.mxu1 %v1580_v11 }
  0x8c   :  { %1456 = vmatprep.subr.bf16.mxu1 %v1709_v0 }
  0x8d   :  { %1437 = vmatpush3.bf16.msra.mxu0 %v1573_v4 }
  0x8e   :  { %1438 = vmatprep.subr.bf16.mxu0 %v1709_v0 }
  0x8f   :  { %1457 = vmatpush3.bf16.msra.mxu1 %v1581_v49 }
  0x90   :  { %1458 = vmatprep.subr.bf16.mxu1 %v1709_v0 }
  0x91   :  { %1439 = vmatpush3.bf16.msra.mxu0 %v1574_v5 }
  0x92   :  { %1440 = vmatprep.subr.bf16.mxu0 %v1709_v0 }
  0x93   :  { %1459 = vmatpush3.bf16.msra.mxu1 %v1582_v50 }
  0x94   :  { %1460 = vmatprep.subr.bf16.mxu1 %v1709_v0 }
  0x95   :  { %1441 = vmatpush3.bf16.msra.mxu0 %v1575_v6 }
  0x97   :  { %1461 = vmatpush3.bf16.msra.mxu1 %v1583_v51 }
 0x118   :  { %v1336_v12 = vpop.f32.mrf.mxu0 }
 0x119   :  { %v1358_v13 = vpop.f32.mrf.mxu1 }
 0x11a   :  { %v1337_v14 = vpop.f32.mrf.mxu0 }
 0x11b   :  { %v1359_v15 = vpop.f32.mrf.mxu1  ;;  %v1338_v17 = vadd.f32 %v1337_v14, %v1336_v12 }
 0x11c   :  { %v1339_v16 = vpop.f32.mrf.mxu0  ;;  %v1360_v22 = vadd.f32 %v1359_v15, %v1358_v13 }
 0x11d   :  { %v1361_v18 = vpop.f32.mrf.mxu1  ;;  %v837_v21 = vadd.f32 %v1338_v17, %v1237_v19 }
 0x11e   :  { %v1340_v20 = vpop.f32.mrf.mxu0 }
 0x11f   :  { %v1341_v23 = vadd.f32 %v1340_v20, %v1339_v16  ;;  %v1362_v24 = vpop.f32.mrf.mxu1  ;;  %v878_v28 = vadd.f32 %v1360_v22, %v837_v21 }
 0x120   :  { %v1363_v33 = vadd.f32 %v1362_v24, %v1361_v18 }
 0x121   :  { %v840_v29 = vadd.f32 %v1341_v23, %v1237_v19 }
 0x123   :  { %v881_v38 = vadd.f32 %v1363_v33, %v840_v29 }
 0x138   :  { %v1380_v25 = vpop.f32.mrf.mxu0 }
 0x139   :  { %v1402_v26 = vpop.f32.mrf.mxu1 }
 0x13a   :  { %v1381_v27 = vpop.f32.mrf.mxu0 }
 0x13b   :  { %v1382_v30 = vadd.f32 %v1381_v27, %v1380_v25  ;;  %v1403_v31 = vpop.f32.mrf.mxu1 }
 0x13c   :  { %v1383_v32 = vpop.f32.mrf.mxu0  ;;  %v1404_v39 = vadd.f32 %v1403_v31, %v1402_v26 }
 0x13d   :  { %v919_v34 = vadd.f32 %v1382_v30, %v878_v28  ;;  %v1405_v35 = vpop.f32.mrf.mxu1 }
 0x13e   :  { %v1384_v36 = vpop.f32.mrf.mxu0 }
 0x13f   :  { %v1385_v40 = vadd.f32 %v1384_v36, %v1383_v32  ;;  %v1406_v41 = vpop.f32.mrf.mxu1  ;;  %v960_v42 = vadd.f32 %v1404_v39, %v919_v34 }
 0x140   :  { %v1407_v44 = vadd.f32 %v1406_v41, %v1405_v35 }
 0x141   :  { %v922_v43 = vadd.f32 %v1385_v40, %v881_v38  ;;  %v966_v46 = vmax.f32 %v960_v42, 0.0 }
 0x143   :  { %v963_v45 = vadd.f32 %v1407_v44, %v922_v43 }
 0x145   :  { %v967_v47 = vmax.f32 %v963_v45, 0.0 }
 0x147   :  { %v968_v48 = vpack.c.bf16 %v967_v47, %v966_v46 }
 0x149   :  { %1443 = vmatmul.mubr.bf16.vlgmr.msra.gmra.mxu0 %v968_v48 }
 0x209   :  { %v1074_v53 = vpop.f32.mrf.mxu0 }
 0x20a   :  { %v1075_v55 = vadd.f32 %v1302_v52, %v1074_v53 }
 0x20b   :  { %v1444_v54 = vpop.f32.mrf.mxu0 }
 0x20c   :  { %v1081_v59 = vmax.f32 %v1075_v55, 0.0 }
 0x20d   :  { %v1077_v56 = vpop.f32.mrf.mxu0 }
 0x20e   :  { %v1078_v57 = vadd.f32 %v1302_v52, %v1077_v56 }
 0x20f   :  { %v1445_v58 = vpop.f32.mrf.mxu0 }
 0x210   :  { %v1082_v60 = vmax.f32 %v1078_v57, 0.0 }
 0x212   :  { %v1083_v61 = vpack.c.bf16 %v1082_v60, %v1081_v59 }
 0x214   :  { %1463 = vmatmul.mubr.bf16.vlgmr.msra.gmra.mxu1 %v1083_v61 }
 0x2d4   :  { %v1189_v63 = vpop.f32.mrf.mxu1 }
 0x2d5   :  { %v1190_v0 = vadd.f32 %v1311_v62, %v1189_v63 }
 0x2d6   :  { %v1464_v37 = vpop.f32.mrf.mxu1 }
 0x2d7   :  { %1196 = vmax.xlane.f32.xlu0 %v1190_v0 }
 0x2d8   :  { %v1192_v1 = vpop.f32.mrf.mxu1 }
 0x2d9   :  { %v1193_v2 = vadd.f32 %v1311_v62, %v1192_v1 }
 0x2da   :  { %v1465_v3 = vpop.f32.mrf.mxu1 }
 0x2db   :  { %1198 = vmax.xlane.f32.xlu0 %v1193_v2 }
 0x360   :  { %v1197_v4 = vpop.xlane.xlu0 %1196 }
 0x361   :  { %v1200_v5 = vsub.f32 %v1190_v0, %v1197_v4 }
 0x363   :  { %v1202_v6 = vmul.f32 1.442695, %v1200_v5 }
 0x364   :  { %v1199_v7 = vpop.xlane.xlu0 %1198 }
 0x365   :  { %v1201_v8 = vsub.f32 %v1193_v2, %v1199_v7  ;;  %1584 = vpow2.f32 %v1202_v6 }
 0x367   :  { %v1204_v9 = vmul.f32 1.442695, %v1201_v8 }
 0x369   :  { %1586 = vpow2.f32 %v1204_v9 }
 0x372   :  { %v1585_v10 = vpop.eup %1584 }
 0x373   :  { %1206 = vadd.xlane.f32.xlu1 %v1585_v10 }
 0x376   :  { %v1587_v11 = vpop.eup %1586 }
 0x377   :  { %1208 = vadd.xlane.f32.xlu1 %v1587_v11 }
 0x3fc   :  { %v1207_v12 = vpop.xlane.xlu1 %1206 }
 0x3fd   :  { %1588 = vlog2.f32 %v1207_v12 }
 0x400   :  { %v1209_v13 = vpop.xlane.xlu1 %1208 }
 0x401   :  { %1590 = vlog2.f32 %v1209_v13 }
 0x40a   :  { %v1589_v14 = vpop.eup %1588 }
 0x40b   :  { %v1211_v15 = vmul.f32 0.6931472, %v1589_v14 }
 0x40d   :  { %v1214_v16 = vsub.f32 %v1200_v5, %v1211_v15 }
 0x40e   :  { %v1591_v17 = vpop.eup %1590 }
 0x40f   :  { %1216 = vst [vmem:[#allocation10] sm:$0xff] %v1214_v16  ;;  %v1213_v18 = vmul.f32 0.6931472, %v1591_v17 }
 0x411   :  { %v1215_v19 = vsub.f32 %v1201_v8, %v1213_v18 }
 0x413   :  { %1217 = vst [vmem:[#allocation10 + $0x8] sm:$0xff] %v1215_v19 }
 0x414   :  { %1222 = vsyncadd [#allocation4], 224  ;;  %s1711_s4 = smov [#allocation10]  }
 0x415   :  { %s1223_s6 = sshll.u32 %s1711_s4, 4  ;;  %s1224_s6 = int_to_ptr.vmem [resolvable:$true] %s1223_s6 }
 0x416   :  { %s1672_s27 = scalar_lea.vmem %s1224_s6, 32  ;;  %s1676_s28 = scalar_lea.vmem %s1224_s6, 256 }
 0x417   :  { %p1673_p6 = scmp.ne.s32.totalorder %s1224_s6, %s1672_s27  ;;  %p1677_p7 = scmp.lt.s32.totalorder %s1224_s6, %s1224_s6 }
 0x418   :  { %p1678_p8 = scmp.lt.s32.totalorder %s1676_s28, %s1672_s27 }
 0x41a   :  { %p1679_p9 = por %p1678_p8, %p1677_p7 }
 0x41c   :  { %p1680_p10 = pnand %p1679_p9, %p1673_p6 }
 0x41e   :  { %1683 = shalt.err (!%p1680_p10)
}
 0x41f   :  { %s1712_s29 = smov 32   ;;  %s1713_s30 = smov 2  }
 0x420   :  { %1229 = dma.vmem_to_hbm [thread:$0]  %s1224_s6, 32, %s1830_s7, [#allocation4], %s1712_s29, %s1712_s29, %s1713_s30  }
 0x421   :  { %1698 = dma.done.wait [#allocation4], 256  }
 0x422   :  { %1699 = vsyncadd [#allocation4], 4294967040 }
 0x423   :  { %1233 = vsyncpa [#allocation3], 1 }
 0x424   :  { %1234 = vsyncpa [#allocation6], 1 }
 0x425   :  { %1235 = vsyncpa [#allocation9], 1 }
 0x426   :  { %1236 = vsyncpa [#allocation4], 1 }

</bundles_post_ra>
